<compile_context>
chip_gen: v5e
topology: v5e:2x2
jax: 0.10.0
libtpu: 0.0.40
codegen_flags: <defaults>
</compile_context>

<pallas_src>
import jax
import jax.numpy as jnp
from jax.experimental import pallas as pl
from jax.experimental.pallas import tpu as pltpu


def autoencoder_kernel(x_ref, wA_ref, wB_ref, wC_ref, bA_ref, bB_ref, out_ref):
    f32 = jnp.float32
    bf16 = jnp.bfloat16

    # Activations enter each MXU dot as bf16; accumulation / bias-add in f32.
    h = x_ref[...].astype(bf16)                                     # (TBp, 128)

    # layer 1: in -> 32 (block-diag 128 -> 256), ReLU
    h = jnp.maximum(
        jnp.dot(h, wA_ref[0], preferred_element_type=f32) + bA_ref[0], 0.0
    ).astype(bf16)
    # layer 2: 32 -> 16 (256 -> 128), ReLU
    h = jnp.maximum(
        jnp.dot(h, wB_ref[0], preferred_element_type=f32) + bB_ref[0], 0.0
    ).astype(bf16)
    # fused layer 3 @ layer 4: 16 -> 16 (128 -> 128), then decoder's first ReLU
    h = jnp.maximum(
        jnp.dot(h, wC_ref[...], preferred_element_type=f32) + bB_ref[1], 0.0
    ).astype(bf16)
    # layer 5: 16 -> 32 (128 -> 256), ReLU
    h = jnp.maximum(
        jnp.dot(h, wA_ref[1], preferred_element_type=f32) + bA_ref[1], 0.0
    ).astype(bf16)
    # layer 6: 32 -> in (256 -> 128), no activation
    y = jnp.dot(h, wB_ref[1], preferred_element_type=f32) + bB_ref[2]

    out_ref[...] = y.astype(out_ref.dtype)                          # lane-dense store


def pack_params(params, *, compute_dtype=jnp.bfloat16, input_dim=16):
    """One-time packing (do this at init, NOT per forward call).

    params: list of 6 (W, b) tuples in layer order; W is (in_features,
    out_features), b is (out_features,).  Returns the 5 packed arrays consumed
    by autoencoder_forward.
    """
    (w1, b1), (w2, b2), (w3, b3), (w4, b4), (w5, b5), (w6, b6) = params

    # Fold the activation-free Linear(16,latent) @ Linear(latent,16) pair.
    w34 = w3 @ w4                       # (16, 16)
    b34 = b3 @ w4 + b4                  # (16,)

    # TODO(synk): lane packing assumes input_dim == 16 (8*16 = 128 lanes);
    # other input dims would need a padded-feature fallback path.
    assert input_dim == 16, "lane packing implemented for input_dim == 16"
    pack = 128 // input_dim             # = 8
    eye = jnp.eye(pack, dtype=jnp.float32)

    def bd(w):    # block-diagonal expansion so packed rows stay independent
        return jnp.kron(eye, w.astype(jnp.float32)).astype(compute_dtype)

    def bdb(b):   # bias replicated per packed sub-row, kept f32 (added to f32 acc)
        return jnp.tile(b.astype(jnp.float32).reshape(1, -1), (1, pack))

    wA = jnp.stack([bd(w1), bd(w5)])                    # (2, 128, 256) bf16
    wB = jnp.stack([bd(w2), bd(w6)])                    # (2, 256, 128) bf16
    wC = bd(w34)                                        # (128, 128)    bf16
    bA = jnp.stack([bdb(b1), bdb(b5)])                  # (2, 1, 256)   f32
    bB = jnp.stack([bdb(b2), bdb(b34), bdb(b6)])        # (3, 1, 128)   f32
    return wA, wB, wC, bA, bB


def autoencoder_forward(x, packed_params, *, packed_block_rows=4096,
                        vmem_limit_bytes=32 * 1024 * 1024):
    """x: (batch, 16) activations; packed_params: output of pack_params()."""
    wA, wB, wC, bA, bB = packed_params
    batch, input_dim = x.shape
    assert input_dim == 16, "lane packing implemented for input_dim == 16"
    pack = 128 // input_dim                              # = 8

    # --- batch tiling ---------------------------------------------------------
    bp = -(-batch // pack)                               # packed rows needed
    bp8 = -(-bp // 8) * 8                                # sublane-aligned
    tbp = max(8, (int(packed_block_rows) // 8) * 8)      # requested tile
    tbp = min(tbp, bp8)                                  # don't exceed the data
    if bp8 >= 16:                                        # >=2 grid steps (v7x megacore)
        tbp = min(tbp, max(8, (bp8 // 2) // 8 * 8))
    bp_pad = -(-bp8 // tbp) * tbp
    batch_pad = bp_pad * pack

    # TODO(synk): for large unaligned batches, handle the ragged tail with a
    # second tiny call instead of this full jnp.pad copy of x.
    x_pad = x if batch_pad == batch else jnp.pad(x, ((0, batch_pad - batch), (0, 0)))
    x_packed = x_pad.reshape(bp_pad, pack * input_dim)   # (bp_pad, 128)

    grid = (bp_pad // tbp,)
    const3 = lambda i: (0, 0, 0)

    # Advisory cost estimate (block-diag MAC count; f32 I/O + resident params).
    macs_per_row = 128 * 256 + 256 * 128 + 128 * 128 + 128 * 256 + 256 * 128
    param_bytes = sum(int(a.size) * a.dtype.itemsize for a in (wA, wB, wC, bA, bB))
    cost = pl.CostEstimate(
        flops=2 * macs_per_row * bp_pad,
        transcendentals=0,
        bytes_accessed=2 * bp_pad * 128 * x.dtype.itemsize + param_bytes,
    )

    out_packed = pl.pallas_call(
        autoencoder_kernel,
        out_shape=jax.ShapeDtypeStruct((bp_pad, 128), x.dtype),
        grid=grid,
        in_specs=[
            pl.BlockSpec((tbp, 128), lambda i: (i, 0)),   # activations: streamed
            pl.BlockSpec(wA.shape, const3),               # params: resident in VMEM
            pl.BlockSpec(wB.shape, const3),
            pl.BlockSpec(wC.shape, lambda i: (0, 0)),
            pl.BlockSpec(bA.shape, const3),
            pl.BlockSpec(bB.shape, const3),
        ],
        out_specs=pl.BlockSpec((tbp, 128), lambda i: (i, 0)),
        compiler_params=pltpu.CompilerParams(
            dimension_semantics=("parallel",),
            vmem_limit_bytes=vmem_limit_bytes,
        ),
        cost_estimate=cost,
    )(x_packed, wA, wB, wC, bA, bB)

    return out_packed.reshape(batch_pad, input_dim)[:batch]


def init_params(key, input_dim, latent_dim):
    """nn.Linear-style init; weights stored transposed as (in_features, out_features)."""
    layer_dims = [
        (input_dim, 32), (32, 16), (16, latent_dim),     # encoder
        (latent_dim, 16), (16, 32), (32, input_dim),     # decoder
    ]
    params = []
    for fan_in, fan_out in layer_dims:
        key, kw, kb = jax.random.split(key, 3)
        bound = 1.0 / jnp.sqrt(float(fan_in))
        w = jax.random.uniform(kw, (fan_in, fan_out), jnp.float32, -bound, bound)
        b = jax.random.uniform(kb, (fan_out,), jnp.float32, -bound, bound)
        params.append((w, b))
    return params


def reference_forward(x, params):
    """Pure-JAX unfused f32 reference (matches the torch module exactly)."""
    h = x
    for i, (w, b) in enumerate(params):
        h = h @ w + b
        if i not in (2, 5):          # no ReLU after encoder output / final layer
            h = jnp.maximum(h, 0.0)
    return h


if __name__ == "__main__":
    key = jax.random.PRNGKey(0)
    batch, input_dim, latent_dim = 96, 16, 4

    k_x, k_p = jax.random.split(key)
    x = jax.random.normal(k_x, (batch, input_dim), dtype=jnp.float32)
    params = init_params(k_p, input_dim, latent_dim)

    # One-time packing (kron / fusion / bf16 cast) hoisted out of the forward.
    packed = pack_params(params)

    # With batch=96 the clamps give tbp=8 packed rows and grid=(2,), so the
    # demo exercises a multi-step ("parallel") grid plus the padded tail path.
    out = autoencoder_forward(x, packed)
    out = jax.block_until_ready(out)

    ref = reference_forward(x, params)
    assert out.shape == (batch, input_dim)
    # bf16 matmul operands (f32 accumulate) -> loosened tolerance vs f32 ref.
    assert jnp.allclose(out, ref, atol=5e-2, rtol=5e-2), "mismatch vs reference"

    print("KERNEL_OK")
</pallas_src>

<mosaic_0001>
module attributes {stable_mosaic.version = 11 : i64} {
  func.func @autoencoder_kernel(%arg0: i32, %arg1: memref<8x128xf32, #tpu.memory_space<vmem>>, %arg2: memref<2x128x256xbf16, #tpu.memory_space<vmem>>, %arg3: memref<2x256x128xbf16, #tpu.memory_space<vmem>>, %arg4: memref<128x128xbf16, #tpu.memory_space<vmem>>, %arg5: memref<2x1x256xf32, #tpu.memory_space<vmem>>, %arg6: memref<3x1x128xf32, #tpu.memory_space<vmem>>, %arg7: memref<8x128xf32, #tpu.memory_space<vmem>>) attributes {dimension_semantics = [#tpu.dimension_semantics<parallel>], iteration_bounds = array<i64: 2>, scalar_prefetch = 0 : i64, scratch_operands = 0 : i64, tpu.core_type = #tpu.core_type<tc>, window_params = [{transform_indices = @transform_0, window_bounds = array<i64: 8, 128>}, {pipeline_mode = #tpu.pipeline_mode<synchronous>, transform_indices = @transform_1, window_bounds = array<i64: 2, 128, 256>}, {pipeline_mode = #tpu.pipeline_mode<synchronous>, transform_indices = @transform_2, window_bounds = array<i64: 2, 256, 128>}, {pipeline_mode = #tpu.pipeline_mode<synchronous>, transform_indices = @transform_3, window_bounds = array<i64: 128, 128>}, {pipeline_mode = #tpu.pipeline_mode<synchronous>, transform_indices = @transform_4, window_bounds = array<i64: 2, 1, 256>}, {pipeline_mode = #tpu.pipeline_mode<synchronous>, transform_indices = @transform_5, window_bounds = array<i64: 3, 1, 128>}, {transform_indices = @transform_6, window_bounds = array<i64: 8, 128>}]} {
    %c0 = arith.constant 0 : index
    %c0_0 = arith.constant 0 : index
    %0 = vector.load %arg1[%c0, %c0_0] : memref<8x128xf32, #tpu.memory_space<vmem>>, vector<8x128xf32>
    %1 = arith.truncf %0 : vector<8x128xf32> to vector<8x128xbf16>
    %c0_1 = arith.constant 0 : index
    %c0_2 = arith.constant 0 : index
    %c0_3 = arith.constant 0 : index
    %2 = vector.load %arg2[%c0_1, %c0_2, %c0_3] : memref<2x128x256xbf16, #tpu.memory_space<vmem>>, vector<1x128x256xbf16>
    %3 = vector.shape_cast %2 : vector<1x128x256xbf16> to vector<128x256xbf16>
    %cst = arith.constant dense<0.000000e+00> : vector<8x256xf32>
    %4 = tpu.matmul %1, %3, %cst {dimension_numbers = #tpu.dot_dimension_numbers<[1], [0], [0], [1], [0, 0, 1, 1], [], []>} : vector<8x128xbf16>, vector<128x256xbf16>, vector<8x256xf32> -> vector<8x256xf32>
    %c0_4 = arith.constant 0 : index
    %c0_5 = arith.constant 0 : index
    %c0_6 = arith.constant 0 : index
    %5 = vector.load %arg5[%c0_4, %c0_5, %c0_6] : memref<2x1x256xf32, #tpu.memory_space<vmem>>, vector<1x1x256xf32>
    %6 = vector.shape_cast %5 : vector<1x1x256xf32> to vector<1x256xf32>
    %7 = vector.broadcast %6 : vector<1x256xf32> to vector<8x256xf32>
    %8 = arith.addf %4, %7 : vector<8x256xf32>
    %cst_7 = arith.constant 0.000000e+00 : f32
    %9 = vector.broadcast %cst_7 : f32 to vector<8x256xf32>
    %10 = arith.maximumf %8, %9 : vector<8x256xf32>
    %11 = arith.truncf %10 : vector<8x256xf32> to vector<8x256xbf16>
    %c0_8 = arith.constant 0 : index
    %c0_9 = arith.constant 0 : index
    %c0_10 = arith.constant 0 : index
    %12 = vector.load %arg3[%c0_8, %c0_9, %c0_10] : memref<2x256x128xbf16, #tpu.memory_space<vmem>>, vector<1x256x128xbf16>
    %13 = vector.shape_cast %12 : vector<1x256x128xbf16> to vector<256x128xbf16>
    %cst_11 = arith.constant dense<0.000000e+00> : vector<8x128xf32>
    %14 = tpu.matmul %11, %13, %cst_11 {dimension_numbers = #tpu.dot_dimension_numbers<[1], [0], [0], [1], [0, 0, 1, 1], [], []>} : vector<8x256xbf16>, vector<256x128xbf16>, vector<8x128xf32> -> vector<8x128xf32>
    %c0_12 = arith.constant 0 : index
    %c0_13 = arith.constant 0 : index
    %c0_14 = arith.constant 0 : index
    %15 = vector.load %arg6[%c0_12, %c0_13, %c0_14] : memref<3x1x128xf32, #tpu.memory_space<vmem>>, vector<1x1x128xf32>
    %16 = vector.shape_cast %15 : vector<1x1x128xf32> to vector<1x128xf32>
    %17 = vector.broadcast %16 : vector<1x128xf32> to vector<8x128xf32>
    %18 = arith.addf %14, %17 : vector<8x128xf32>
    %cst_15 = arith.constant 0.000000e+00 : f32
    %19 = vector.broadcast %cst_15 : f32 to vector<8x128xf32>
    %20 = arith.maximumf %18, %19 : vector<8x128xf32>
    %21 = arith.truncf %20 : vector<8x128xf32> to vector<8x128xbf16>
    %c0_16 = arith.constant 0 : index
    %c0_17 = arith.constant 0 : index
    %22 = vector.load %arg4[%c0_16, %c0_17] : memref<128x128xbf16, #tpu.memory_space<vmem>>, vector<128x128xbf16>
    %cst_18 = arith.constant dense<0.000000e+00> : vector<8x128xf32>
    %23 = tpu.matmul %21, %22, %cst_18 {dimension_numbers = #tpu.dot_dimension_numbers<[1], [0], [0], [1], [0, 0, 1, 1], [], []>} : vector<8x128xbf16>, vector<128x128xbf16>, vector<8x128xf32> -> vector<8x128xf32>
    %c1 = arith.constant 1 : index
    %c0_19 = arith.constant 0 : index
    %c0_20 = arith.constant 0 : index
    %24 = vector.load %arg6[%c1, %c0_19, %c0_20] : memref<3x1x128xf32, #tpu.memory_space<vmem>>, vector<1x1x128xf32>
    %25 = vector.shape_cast %24 : vector<1x1x128xf32> to vector<1x128xf32>
    %26 = vector.broadcast %25 : vector<1x128xf32> to vector<8x128xf32>
    %27 = arith.addf %23, %26 : vector<8x128xf32>
    %cst_21 = arith.constant 0.000000e+00 : f32
    %28 = vector.broadcast %cst_21 : f32 to vector<8x128xf32>
    %29 = arith.maximumf %27, %28 : vector<8x128xf32>
    %30 = arith.truncf %29 : vector<8x128xf32> to vector<8x128xbf16>
    %c1_22 = arith.constant 1 : index
    %c0_23 = arith.constant 0 : index
    %c0_24 = arith.constant 0 : index
    %31 = vector.load %arg2[%c1_22, %c0_23, %c0_24] : memref<2x128x256xbf16, #tpu.memory_space<vmem>>, vector<1x128x256xbf16>
    %32 = vector.shape_cast %31 : vector<1x128x256xbf16> to vector<128x256xbf16>
    %cst_25 = arith.constant dense<0.000000e+00> : vector<8x256xf32>
    %33 = tpu.matmul %30, %32, %cst_25 {dimension_numbers = #tpu.dot_dimension_numbers<[1], [0], [0], [1], [0, 0, 1, 1], [], []>} : vector<8x128xbf16>, vector<128x256xbf16>, vector<8x256xf32> -> vector<8x256xf32>
    %c1_26 = arith.constant 1 : index
    %c0_27 = arith.constant 0 : index
    %c0_28 = arith.constant 0 : index
    %34 = vector.load %arg5[%c1_26, %c0_27, %c0_28] : memref<2x1x256xf32, #tpu.memory_space<vmem>>, vector<1x1x256xf32>
    %35 = vector.shape_cast %34 : vector<1x1x256xf32> to vector<1x256xf32>
    %36 = vector.broadcast %35 : vector<1x256xf32> to vector<8x256xf32>
    %37 = arith.addf %33, %36 : vector<8x256xf32>
    %cst_29 = arith.constant 0.000000e+00 : f32
    %38 = vector.broadcast %cst_29 : f32 to vector<8x256xf32>
    %39 = arith.maximumf %37, %38 : vector<8x256xf32>
    %40 = arith.truncf %39 : vector<8x256xf32> to vector<8x256xbf16>
    %c1_30 = arith.constant 1 : index
    %c0_31 = arith.constant 0 : index
    %c0_32 = arith.constant 0 : index
    %41 = vector.load %arg3[%c1_30, %c0_31, %c0_32] : memref<2x256x128xbf16, #tpu.memory_space<vmem>>, vector<1x256x128xbf16>
    %42 = vector.shape_cast %41 : vector<1x256x128xbf16> to vector<256x128xbf16>
    %cst_33 = arith.constant dense<0.000000e+00> : vector<8x128xf32>
    %43 = tpu.matmul %40, %42, %cst_33 {dimension_numbers = #tpu.dot_dimension_numbers<[1], [0], [0], [1], [0, 0, 1, 1], [], []>} : vector<8x256xbf16>, vector<256x128xbf16>, vector<8x128xf32> -> vector<8x128xf32>
    %c2 = arith.constant 2 : index
    %c0_34 = arith.constant 0 : index
    %c0_35 = arith.constant 0 : index
    %44 = vector.load %arg6[%c2, %c0_34, %c0_35] : memref<3x1x128xf32, #tpu.memory_space<vmem>>, vector<1x1x128xf32>
    %45 = vector.shape_cast %44 : vector<1x1x128xf32> to vector<1x128xf32>
    %46 = vector.broadcast %45 : vector<1x128xf32> to vector<8x128xf32>
    %47 = arith.addf %43, %46 : vector<8x128xf32>
    %c0_36 = arith.constant 0 : index
    %c0_37 = arith.constant 0 : index
    %48 = vector.load %arg7[%c0_36, %c0_37] : memref<8x128xf32, #tpu.memory_space<vmem>>, vector<8x128xf32>
    tpu.vector_store %arg7[%c0_36, %c0_37], %47 {strides = array<i32>} : memref<8x128xf32, #tpu.memory_space<vmem>>, vector<8x128xf32>,
    return
  }
  func.func @transform_0(%arg0: i32) -> (i32, i32) {
    %c0_i32 = arith.constant 0 : i32
    %c0_i32_0 = arith.constant 0 : i32
    return %arg0, %c0_i32 : i32, i32
  }
  func.func @transform_1(%arg0: i32) -> (i32, i32, i32) {
    %c0_i32 = arith.constant 0 : i32
    %c0_i32_0 = arith.constant 0 : i32
    %c0_i32_1 = arith.constant 0 : i32
    %c0_i32_2 = arith.constant 0 : i32
    return %c0_i32, %c0_i32_0, %c0_i32_1 : i32, i32, i32
  }
  func.func @transform_2(%arg0: i32) -> (i32, i32, i32) {
    %c0_i32 = arith.constant 0 : i32
    %c0_i32_0 = arith.constant 0 : i32
    %c0_i32_1 = arith.constant 0 : i32
    %c0_i32_2 = arith.constant 0 : i32
    return %c0_i32, %c0_i32_0, %c0_i32_1 : i32, i32, i32
  }
  func.func @transform_3(%arg0: i32) -> (i32, i32) {
    %c0_i32 = arith.constant 0 : i32
    %c0_i32_0 = arith.constant 0 : i32
    %c0_i32_1 = arith.constant 0 : i32
    return %c0_i32, %c0_i32_0 : i32, i32
  }
  func.func @transform_4(%arg0: i32) -> (i32, i32, i32) {
    %c0_i32 = arith.constant 0 : i32
    %c0_i32_0 = arith.constant 0 : i32
    %c0_i32_1 = arith.constant 0 : i32
    %c0_i32_2 = arith.constant 0 : i32
    return %c0_i32, %c0_i32_0, %c0_i32_1 : i32, i32, i32
  }
  func.func @transform_5(%arg0: i32) -> (i32, i32, i32) {
    %c0_i32 = arith.constant 0 : i32
    %c0_i32_0 = arith.constant 0 : i32
    %c0_i32_1 = arith.constant 0 : i32
    %c0_i32_2 = arith.constant 0 : i32
    return %c0_i32, %c0_i32_0, %c0_i32_1 : i32, i32, i32
  }
  func.func @transform_6(%arg0: i32) -> (i32, i32) {
    %c0_i32 = arith.constant 0 : i32
    %c0_i32_0 = arith.constant 0 : i32
    return %arg0, %c0_i32 : i32, i32
  }
}

</mosaic_0001>

<bundles_post_ra>
// kernel: tpu_custom_call.1
= control target key start
LH: loop header
LB: loop body
LE: loop exit
PB: predicated region body
PF: predicated region fallthrough
CT: control target
= control target key end

     0   :  { %s2064_s0 = inlined_call_operand.hbm [shape: f32[16,128], index: 0, kind: input, shape index: {}]   ;;  %s2065_s1 = inlined_call_operand.hbm [shape: bf16[2,128,256], index: 1, kind: input, shape index: {}]   ;;  %s2066_s2 = inlined_call_operand.hbm [shape: bf16[2,256,128], index: 2, kind: input, shape index: {}]   ;;  %s2067_s3 = inlined_call_operand.hbm [shape: bf16[128,128], index: 3, kind: input, shape index: {}]   ;;  %s2068_s4 = inlined_call_operand.hbm [shape: f32[2,1,256], index: 4, kind: input, shape index: {}]   ;;  %s2069_s5 = inlined_call_operand.vmem [shape: f32[3,1,128], index: 5, kind: input, shape index: {}]   ;;  %s2070_s6 = inlined_call_operand.hbm [shape: f32[16,128], index: 6, kind: output, shape index: {}]  }
   0x1   :  { %2071 = sst [smem:[#allocation16_spill]] %s2065_s1 }
   0x2   :  { %11 = vsyncpa [#allocation3], 0 }
   0x3   :  { %13 = vsyncpa [#allocation3 + $0x1], 0 }
   0x4   :  { %14 = vsyncpa [#allocation6], 0 }
   0x5   :  { %15 = vsyncpa [#allocation9], 0 }
   0x6   :  { %16 = vsyncpa [#allocation4], 0 }
   0x7   :  { %18 = vsyncpa [#allocation4 + $0x1], 0  ;;  %s1881_s21 = smov 0   ;;  %s1883_s22 = smov 0  }
   0x8   :  { %s1885_s23 = smov 0   ;;  %s1887_s24 = smov 0  }
   0x9 LB: > { %s2072_s1 = sld [smem:[#allocation16_spill]]  ;;  %s1905_s28 = sadd.s32 4294967295, %s1834_s24   ;;  %s1834_s24 = sphi %s1887_s24, %s2084_s24   ;;  %s1830_s23 = sphi %s1885_s23, %s2083_s23   ;;  %s1826_s22 = sphi %s1883_s22, %s2082_s22   ;;  %s1822_s21 = sphi %s1881_s21, %s2081_s21  }
   0xa   : > { %p1133_p0 = scmp.ge.s32.totalorder %s1834_s24, 1  ;;  %p45_p1 = scmp.eq.s32.totalorder %s1905_s28, 0 }
   0xb   : > { %p186_p2 = scmp.lt.s32.totalorder %s1834_s24, 3  ;;  %s1836_s30 = smov [#allocation5]  }
   0xc   : > { %s199_s7 = sshll.u32 %s1836_s30, 4  ;;  %s225_s11 = sshll.u32 %s2067_s3, 4  ;;  %s200_s7 = int_to_ptr.vmem [resolvable:$true] %s199_s7  ;;  %s226_s11 = int_to_ptr.hbm [resolvable:$true] %s225_s11 }
   0xd   : > { %p1910_p3 = pnand %p1133_p0, %p186_p2  ;;  %s1837_s12 = smov 128  }
   0xe   : > { %s1838_s13 = smov 8   ;;  %s1839_s14 = smov [#allocation8]  }
   0xf   : > { %s197_s27 = sshll.u32 %s2072_s1, 4  ;;  %p1534_p4 = pneg %p1910_p3  ;;  %s198_s27 = int_to_ptr.hbm [resolvable:$true] %s197_s27 }
  0x10   : > { %s227_s15 = sshll.u32 %s1839_s14, 4  ;;  %s211_s18 = sshll.u32 %s2066_s2, 4  ;;  %s228_s15 = int_to_ptr.vmem [resolvable:$true] %s227_s15  ;;  %s212_s18 = int_to_ptr.hbm [resolvable:$true] %s211_s18 }
  0x11   : > { %p1919_p6 = pnand %p1534_p4, %p45_p1  ;;  %s1840_s19 = smov 64  }
  0x12   : > { %s1841_s20 = smov 4   ;;  %s1842_s30 = smov [#allocation7]  }
  0x13   : > { %1537 = dma.hbm_to_vmem [thread:$0]  (!%p1919_p6), %s198_s27, 4096, %s200_s7, [#allocation6], %s1837_s12, %s1837_s12, %s1838_s13  }
  0x14   : > { %1543 = dma.hbm_to_vmem [thread:$0]  (!%p1919_p6), %s226_s11, 1024, %s228_s15, [#allocation9], %s1840_s19, %s1840_s19, %s1841_s20  }
  0x15   : > { %s239_s27 = sshll.u32 %s2068_s4, 4  ;;  %s213_s7 = sshll.u32 %s1842_s30, 4  ;;  %s240_s27 = int_to_ptr.hbm [resolvable:$true] %s239_s27  ;;  %s214_s7 = int_to_ptr.vmem [resolvable:$true] %s213_s7 }
  0x16   : > { %1540 = dma.hbm_to_vmem [thread:$0]  (!%p1919_p6), %s212_s18, 4096, %s214_s7, [#allocation6], %s1840_s19, %s1840_s19, %s1841_s20  }
  0x17   : > { %s1843_s9 = smov [#allocation10]   ;;  %s1844_s11 = smov 32  }
  0x18   : > { %s241_s10 = sshll.u32 %s1843_s9, 4  ;;  %s1845_s12 = smov 2   ;;  %s242_s10 = int_to_ptr.vmem [resolvable:$true] %s241_s10 }
  0x19   : > { %1546 = dma.hbm_to_vmem [thread:$0]  (!%p1919_p6), %s240_s27, 64, %s242_s10, [#allocation9], %s1844_s11, %s1844_s11, %s1845_s12  }
  0x1a   : > { %s1132_s13 = sadd.s32 4294967294, %s1834_s24   ;;  %s1942_s14 = sadd.s32 1, %s1834_s24  }
  0x1b   : > { %s28_s15 = ssub.s32 %s1834_s24, %s1942_s14  ;;  %s31_s16 = sadd.s32 1, %s1830_s23 }
  0x1c   : > { %p29_p7 = scmp.eq.s32.totalorder %s28_s15, 0  ;;  %p38_p8 = scmp.ne.s32.totalorder %s1830_s23, %s1826_s22 }
  0x1d   : > { %p39_p9 = scmp.eq.s32.totalorder %s1834_s24, 0  ;;  %p44_p10 = scmp.ne.s32.totalorder %s1826_s22, %s1822_s21 }
  0x1e   : > { %s1953_s17 = scalar_select %p29_p7, %s1830_s23, %s31_s16  }
  0x1f   : > { %p1955_p11 = por %p39_p9, %p38_p8  ;;  %p1961_p12 = por %p45_p1, %p44_p10 }
  0x20   : > { %p173_p13 = scmp.eq.s32.totalorder %s1905_s28, 1  ;;  %p179_p0 = scmp.eq.s32.totalorder %s1132_s13, 1 }
  0x21   : > { %p1559_p2 = scmp.lt.s32.totalorder %s1834_s24, 2  ;;  %s258_s19 = sand.u32 1, %s1830_s23  }
  0x22   : > { %p1968_p4 = por %p173_p13, %p38_p8  ;;  %p1972_p6 = por %p179_p0, %p44_p10 }
  0x23   : > { %s1139_s26 = sshll.u32 %s258_s19, 3  ;;  %s1140_s27 = sshll.u32 %s1834_s24, 3 }
  0x24   : > { %s266_s9 = scalar_lea.hbm %s2064_s0, %s1140_s27  ;;  %s262_s10 = scalar_lea.vmem [#allocation2], %s1139_s26 }
  0x25   : > { %s270_s11 = sshll.u32 %s262_s10, 4  ;;  %s268_s12 = sshll.u32 %s266_s9, 4  ;;  %s271_s11 = int_to_ptr.vmem [resolvable:$true] %s270_s11  ;;  %s269_s12 = int_to_ptr.hbm [resolvable:$true] %s268_s12 }
  0x26   : > { %p1982_p7 = pnand %p1559_p2, %p1955_p11  ;;  %s259_s15 = scalar_lea.sflag [#allocation3], %s258_s19 }
  0x27   : > { %s1730_s16 = sshra.s32 %s269_s12, 4  ;;  %s1737_s30 = scalar_lea.hbm %s2064_s0, 16  ;;  %s1731_s16 = int_to_ptr.hbm [resolvable:$true] %s1730_s16 }
  0x28   : > { %s1732_s1 = scalar_lea.hbm %s1731_s16, 8  ;;  %p1734_p9 = pneg %p1982_p7 }
  0x29   : > { %p1733_p8 = scmp.ne.s32.totalorder %s1731_s16, %s1732_s1  ;;  %p1738_p11 = scmp.lt.s32.totalorder %s1731_s16, %s2064_s0 }
  0x2a   : > { %p1739_p0 = scmp.lt.s32.totalorder %s1737_s30, %s1732_s1 }
  0x2b   : > { %p1735_p10 = pnand %p1734_p9, %p1733_p8 }
  0x2c   : > { %p1740_p2 = por %p1739_p0, %p1738_p11 }
  0x2d   : > { %p1736_p13 = pneg %p1735_p10 }
  0x2f   : > { %p1741_p5 = pnand %p1740_p2, %p1736_p13 }
  0x31   : > { %1744 = shalt.err (!%p1741_p5)
}
  0x32   : > { %1550 = dma.hbm_to_vmem [thread:$0]  (!%p1982_p7), %s269_s12, 128, %s271_s11, %s259_s15  }
  0x33   : > { %279 = sbr.rel (%p1910_p3) target bundleno = 771 (0x303), region = 44  ;;  %s1999_s19 = sand.u32 (!%p1910_p3), 1, %s1826_s22  }
  0x34   : > { %s1142_s9 = sshll.u32 (!%p1910_p3), %s1999_s19, 3  ;;  %s282_s10 = scalar_lea.sflag (!%p1910_p3), [#allocation3], %s1999_s19 }
  0x35   : > { %s2005_s1 = scalar_lea.vmem (!%p1910_p3), [#allocation2], %s1142_s9 }
  0x38   : > { %1805 = dma.done.wait (%p1961_p12), %s282_s10, 128  }
  0x39   : > { %1807 = vsyncadd (%p1961_p12), %s282_s10, 4294967168 }
  0x3a   : > { %1809 = dma.done.wait (%p45_p1), [#allocation6], 8192  }
  0x3b   : > { %1811 = vsyncadd (%p45_p1), [#allocation6], 4294959104 }
  0x3c   : > { %1813 = dma.done.wait (%p45_p1), [#allocation9], 1088  }
  0x3d   : > { %1815 = vsyncadd (%p45_p1), [#allocation9], 4294966208  ;;  %v1206_v0 = vld [vmem:[#allocation5 + $0x70] sm:$0xf]  ;;  %v1457_v1 = vld [vmem:[#allocation5 + $0x74] sm:$0xf0] }
  0x3e   : > { %v1456_v2 = vld [vmem:[#allocation5 + $0x74] sm:$0xf]  ;;  %v1207_v3 = vor.u32 %v1457_v1, %v1206_v0  ;;  %v1208_v4 = vld [vmem:[#allocation5 + $0x78] sm:$0xf0]  ;;  %v1198_v5 = vld [vmem:[#allocation5 + $0x60] sm:$0xf] }
  0x3f   : > { %v1455_v6 = vld [vmem:[#allocation5 + $0x64] sm:$0xf0]  ;;  %v1211_v7 = vor.u32 %v1456_v2, %v1208_v4  ;;  %v1454_v8 = vld [vmem:[#allocation5 + $0x64] sm:$0xf]  ;;  %v1200_v9 = vld [vmem:[#allocation5 + $0x68] sm:$0xf0] }
  0x40   : > { %439 = vmatpush.bf16.msra.mxu0 %v1207_v3  ;;  %v1199_v10 = vor.u32 %v1455_v6, %v1198_v5  ;;  %v1203_v11 = vor.u32 %v1454_v8, %v1200_v9  ;;  %v1190_v12 = vld [vmem:[#allocation5 + $0x50] sm:$0xf]  ;;  %v1453_v13 = vld [vmem:[#allocation5 + $0x54] sm:$0xf0]  ;;  %v1452_v14 = vld [vmem:[#allocation5 + $0x54] sm:$0xf] }
  0x41   : > { %452 = vmatpush.bf16.msra.mxu1 %v1211_v7  ;;  %v1192_v15 = vld [vmem:[#allocation5 + $0x58] sm:$0xf0]  ;;  %v1191_v16 = vor.u32 %v1453_v13, %v1190_v12  ;;  %v1182_v18 = vld [vmem:[#allocation5 + $0x40] sm:$0xf]  ;;  %v1451_v19 = vld [vmem:[#allocation5 + $0x44] sm:$0xf0] }
  0x42   : > { %v1195_v17 = vor.u32 %v1452_v14, %v1192_v15  ;;  %v1450_v20 = vld [vmem:[#allocation5 + $0x44] sm:$0xf]  ;;  %v1184_v21 = vld [vmem:[#allocation5 + $0x48] sm:$0xf0]  ;;  %v1183_v22 = vor.u32 %v1451_v19, %v1182_v18  ;;  %v1465_v23 = vld [vmem:[#allocation7 + $0x38] sm:$0xff]  ;;  %s1439_s13 = sshll.u32 %s1905_s28, 3 }
  0x43   : > { %v1473_v24 = vld [vmem:[#allocation7 + $0x78] sm:$0xff]  ;;  %v1187_v25 = vor.u32 %v1450_v20, %v1184_v21  ;;  %v1174_v26 = vld [vmem:[#allocation5 + $0x30] sm:$0xf]  ;;  %v1448_v28 = vld [vmem:[#allocation5 + $0x34] sm:$0xf]  ;;  %601 = vmatpush.bf16.msra.mxu2 %v1465_v23  ;;  %s1019_s30 = scalar_lea.hbm %s2070_s6, %s1439_s13  ;;  %s334_s7 = scalar_lea.vmem [#allocation11], %s1142_s9 }
  0x44   : > { %440 = vmatpush.bf16.msra.mxu0 %v1199_v10  ;;  %v1449_v27 = vld [vmem:[#allocation5 + $0x34] sm:$0xf0]  ;;  %v1176_v29 = vld [vmem:[#allocation5 + $0x38] sm:$0xf0]  ;;  %614 = vmatpush.bf16.msra.mxu3 %v1473_v24  ;;  %v1464_v30 = vld [vmem:[#allocation7 + $0x30] sm:$0xff]  ;;  %s1021_s18 = sshll.u32 %s334_s7, 4  ;;  %s1022_s18 = int_to_ptr.vmem [resolvable:$true] %s1021_s18 }
  0x45   : > { %453 = vmatpush.bf16.msra.mxu1 %v1203_v11  ;;  %v1472_v31 = vld [vmem:[#allocation7 + $0x70] sm:$0xff]  ;;  %v1175_v32 = vor.u32 %v1449_v27, %v1174_v26  ;;  %v1166_v33 = vld [vmem:[#allocation5 + $0x20] sm:$0xf]  ;;  %v1179_v34 = vor.u32 %v1448_v28, %v1176_v29  ;;  %v1447_v35 = vld [vmem:[#allocation5 + $0x24] sm:$0xf0]  ;;  %s1023_s10 = sshll.u32 %s1019_s30, 4  ;;  %s1024_s10 = int_to_ptr.hbm [resolvable:$true] %s1023_s10 }
  0x46   : > { %v1446_v36 = vld [vmem:[#allocation5 + $0x24] sm:$0xf]  ;;  %v1168_v37 = vld [vmem:[#allocation5 + $0x28] sm:$0xf0]  ;;  %v1167_v40 = vor.u32 %v1447_v35, %v1166_v33  ;;  %v1158_v42 = vld [vmem:[#allocation5 + $0x10] sm:$0xf] }
  0x47   : > { %602 = vmatpush.bf16.msra.mxu2 %v1464_v30  ;;  %v1463_v38 = vld [vmem:[#allocation7 + $0x28] sm:$0xff]  ;;  %v1171_v41 = vor.u32 %v1446_v36, %v1168_v37  ;;  %v1445_v43 = vld [vmem:[#allocation5 + $0x14] sm:$0xf0]  ;;  %v1444_v44 = vld [vmem:[#allocation5 + $0x14] sm:$0xf]  ;;  %s1009_s28 = scalar_lea.sflag [#allocation4], %s1999_s19 }
  0x48   : > { %441 = vmatpush.bf16.msra.mxu0 %v1191_v16  ;;  %615 = vmatpush.bf16.msra.mxu3 %v1472_v31  ;;  %v1471_v39 = vld [vmem:[#allocation7 + $0x68] sm:$0xff]  ;;  %v1160_v45 = vld [vmem:[#allocation5 + $0x18] sm:$0xf0]  ;;  %v1462_v46 = vld [vmem:[#allocation7 + $0x20] sm:$0xff]  ;;  %v1159_v48 = vor.u32 %v1445_v43, %v1158_v42  ;;  %s1780_s12 = scalar_lea.hbm %s2070_s6, 16 }
  0x49   : > { %454 = vmatpush.bf16.msra.mxu1 %v1195_v17  ;;  %v1470_v47 = vld [vmem:[#allocation7 + $0x60] sm:$0xff]  ;;  %v1163_v49 = vor.u32 %v1444_v44, %v1160_v45  ;;  %v1443_v51 = vld [vmem:[#allocation5 + $0x4] sm:$0xf0]  ;;  %v1152_v53 = vld [vmem:[#allocation5 + $0x8] sm:$0xf0] }
  0x4a   : > { %v1150_v50 = vld [vmem:[#allocation5] sm:$0xf]  ;;  %v1442_v52 = vld [vmem:[#allocation5 + $0x4] sm:$0xf]  ;;  %v1461_v54 = vld [vmem:[#allocation7 + $0x18] sm:$0xff] }
  0x4b   : > { %603 = vmatpush.bf16.msra.mxu2 %v1463_v38  ;;  %v1469_v55 = vld [vmem:[#allocation7 + $0x58] sm:$0xff]  ;;  %v1151_v56 = vor.u32 %v1443_v51, %v1150_v50  ;;  %v1155_v58 = vor.u32 %v1442_v52, %v1152_v53  ;;  %v1460_v59 = vld [vmem:[#allocation7 + $0x10] sm:$0xff]  ;;  %v1459_v62 = vld [vmem:[#allocation7 + $0x8] sm:$0xff] }
  0x4c   : > { %442 = vmatpush.bf16.msra.mxu0 %v1183_v22  ;;  %616 = vmatpush.bf16.msra.mxu3 %v1471_v39  ;;  %v335_v57 = vld [vmem:[%s2005_s1] sm:$0xff]  ;;  %v1467_v63 = vld [vmem:[#allocation7 + $0x48] sm:$0xff]  ;;  %v1458_v0 = vld [vmem:[#allocation7] sm:$0xff]  ;;  %s1774_s1 = sshra.s32 %s1024_s10, 4  ;;  %s1775_s1 = int_to_ptr.hbm [resolvable:$true] %s1774_s1 }
  0x4d   : > { %455 = vmatpush.bf16.msra.mxu1 %v1187_v25  ;;  %v1468_v60 = vld [vmem:[#allocation7 + $0x50] sm:$0xff]  ;;  %v336_v61 = vpack.c.bf16 %v335_v57, %v335_v57  ;;  %v1466_v1 = vld [vmem:[#allocation7 + $0x40] sm:$0xff]  ;;  %v1481_v2 = vld [vmem:[#allocation8 + $0x38] sm:$0xff]  ;;  %s1776_s29 = scalar_lea.hbm %s1775_s1, 8  ;;  %p1781_p12 = scmp.lt.s32.totalorder %s1775_s1, %s2070_s6 }
  0x4e   : > { %v1480_v3 = vld [vmem:[#allocation8 + $0x30] sm:$0xff]  ;;  %v1479_v4 = vld [vmem:[#allocation8 + $0x28] sm:$0xff]  ;;  %v1478_v5 = vld [vmem:[#allocation8 + $0x20] sm:$0xff]  ;;  %p1777_p1 = scmp.ne.s32.totalorder %s1775_s1, %s1776_s29  ;;  %p1782_p7 = scmp.lt.s32.totalorder %s1780_s12, %s1776_s29 }
  0x4f   : > { %604 = vmatpush.bf16.msra.mxu2 %v1462_v46  ;;  %v1477_v6 = vld [vmem:[#allocation8 + $0x18] sm:$0xff]  ;;  %v353_v7 = vld [vmem:[#allocation10] sm:$0x3]  ;;  %v1476_v8 = vld [vmem:[#allocation8 + $0x10] sm:$0xff] }
  0x50   : > { %443 = vmatpush.bf16.msra.mxu0 %v1175_v32  ;;  %617 = vmatpush.bf16.msra.mxu3 %v1470_v47  ;;  %v355_v9 = vperm.slane %v353_v7, 0  ;;  %v356_v10 = vperm.slane %v353_v7, 1  ;;  %v1475_v21 = vld [vmem:[#allocation8 + $0x8] sm:$0xff]  ;;  %v1474_v22 = vld [vmem:[#allocation8] sm:$0xff]  ;;  %v1367_v23 = vld [vmem:[#allocation5 + $0xf0] sm:$0xf]  ;;  %p1778_p3 = pnand %p1777_p1, %p1968_p4  ;;  %p1783_p8 = por %p1782_p7, %p1781_p12 }
  0x51   : > { %456 = vmatpush.bf16.msra.mxu1 %v1179_v34  ;;  %v1497_v24 = vld [vmem:[#allocation5 + $0xf4] sm:$0xf0]  ;;  %v1496_v25 = vld [vmem:[#allocation5 + $0xf4] sm:$0xf]  ;;  %v1369_v27 = vld [vmem:[#allocation5 + $0xf8] sm:$0xf0] }
  0x52   : > { %v1368_v26 = vor.u32 %v1497_v24, %v1367_v23  ;;  %v1359_v28 = vld [vmem:[#allocation5 + $0xe0] sm:$0xf]  ;;  %v1495_v29 = vld [vmem:[#allocation5 + $0xe4] sm:$0xf0]  ;;  %v1372_v30 = vor.u32 %v1496_v25, %v1369_v27  ;;  %v1494_v31 = vld [vmem:[#allocation5 + $0xe4] sm:$0xf]  ;;  %p1779_p5 = pneg %p1778_p3 }
  0x53   : > { %605 = vmatpush.bf16.msra.mxu2 %v1461_v54  ;;  %v1361_v32 = vld [vmem:[#allocation5 + $0xe8] sm:$0xf0]  ;;  %v1360_v33 = vor.u32 %v1495_v29, %v1359_v28  ;;  %v1351_v35 = vld [vmem:[#allocation5 + $0xd0] sm:$0xf]  ;;  %v1493_v36 = vld [vmem:[#allocation5 + $0xd4] sm:$0xf0] }
  0x54   : > { %444 = vmatpush.bf16.msra.mxu0 %v1167_v40  ;;  %618 = vmatpush.bf16.msra.mxu3 %v1469_v55  ;;  %v1364_v34 = vor.u32 %v1494_v31, %v1361_v32  ;;  %v1492_v37 = vld [vmem:[#allocation5 + $0xd4] sm:$0xf]  ;;  %v1353_v38 = vld [vmem:[#allocation5 + $0xd8] sm:$0xf0]  ;;  %v1352_v39 = vor.u32 %v1493_v36, %v1351_v35  ;;  %v1491_v42 = vld [vmem:[#allocation5 + $0xc4] sm:$0xf0]  ;;  %p1784_p9 = pnand %p1783_p8, %p1779_p5 }
  0x55   : > { %457 = vmatpush.bf16.msra.mxu1 %v1171_v41  ;;  %v1356_v40 = vor.u32 %v1492_v37, %v1353_v38  ;;  %v1343_v41 = vld [vmem:[#allocation5 + $0xc0] sm:$0xf]  ;;  %v1490_v43 = vld [vmem:[#allocation5 + $0xc4] sm:$0xf]  ;;  %v1345_v44 = vld [vmem:[#allocation5 + $0xc8] sm:$0xf0] }
  0x56   : > { %v1344_v45 = vor.u32 %v1491_v42, %v1343_v41  ;;  %v1348_v46 = vor.u32 %v1490_v43, %v1345_v44  ;;  %v1335_v47 = vld [vmem:[#allocation5 + $0xb0] sm:$0xf]  ;;  %v1337_v50 = vld [vmem:[#allocation5 + $0xb8] sm:$0xf0]  ;;  %v1327_v53 = vld [vmem:[#allocation5 + $0xa0] sm:$0xf] }
  0x57   : > { %606 = vmatpush.bf16.msra.mxu2 %v1460_v59  ;;  %v1487_v54 = vld [vmem:[#allocation5 + $0xa4] sm:$0xf0]  ;;  %v1486_v55 = vld [vmem:[#allocation5 + $0xa4] sm:$0xf]  ;;  %v1501_v24 = vld [vmem:[#allocation7 + $0x98] sm:$0xff] }
  0x58   : > { %445 = vmatpush.bf16.msra.mxu0 %v1159_v48  ;;  %619 = vmatpush.bf16.msra.mxu3 %v1468_v60  ;;  %v1489_v48 = vld [vmem:[#allocation5 + $0xb4] sm:$0xf0]  ;;  %v1328_v57 = vor.u32 %v1487_v54, %v1327_v53  ;;  %v1510_v23 = vld [vmem:[#allocation7 + $0xe0] sm:$0xff]  ;;  %v1608_v27 = vld [vmem:[%s2069_s5 + $0x1] ss:$0 sm:$0xff] }
  0x59   : > { %458 = vmatpush.bf16.msra.mxu1 %v1163_v49  ;;  %v1488_v49 = vld [vmem:[#allocation5 + $0xb4] sm:$0xf]  ;;  %v1336_v51 = vor.u32 %v1489_v48, %v1335_v47  ;;  %v1509_v25 = vld [vmem:[#allocation7 + $0xd8] sm:$0xff]  ;;  %v1498_v35 = vld [vmem:[#allocation7 + $0x80] sm:$0xff] }
  0x5a   : > { %v1340_v52 = vor.u32 %v1488_v49, %v1337_v50  ;;  %v1507_v36 = vld [vmem:[#allocation7 + $0xc8] sm:$0xff]  ;;  %v1506_v37 = vld [vmem:[#allocation7 + $0xc0] sm:$0xff] }
  0x5b   : > { %607 = vmatpush.bf16.msra.mxu2 %v1459_v62  ;;  %v731_v38 = vld [vmem:[#allocation10 + $0x2] sm:$0x3] }
  0x5c   : > { %446 = vmatpush.bf16.msra.mxu0 %v1151_v56  ;;  %620 = vmatpush.bf16.msra.mxu3 %v1467_v63  ;;  %v1329_v56 = vld [vmem:[#allocation5 + $0xa8] sm:$0xf0]  ;;  %v734_v43 = vperm.slane %v731_v38, 1 }
  0x5d   : > { %459 = vmatpush.bf16.msra.mxu1 %v1155_v58  ;;  %v1607_v58 = vld [vmem:[%s2069_s5] ss:$0 sm:$0xff]  ;;  %v1332_v59 = vor.u32 %v1486_v55, %v1329_v56 }
  0x5f   : > { %447 = vmatmul.bf16.vlgmr.msra.gmra.mxu0 %v336_v61  ;;  %608 = vmatpush.bf16.msra.mxu2 %v1458_v0 }
  0x60   : > { %460 = vmatmul.bf16.vlgmr.msra.gmra.mxu1 %v336_v61  ;;  %621 = vmatpush.bf16.msra.mxu3 %v1466_v1 }
  0x61   : > { %698 = vmatpush.bf16.msrb.mxu0 %v1481_v2  ;;  %817 = vmatpush.bf16.msrb.mxu1 %v1368_v26  ;;  %v1500_v26 = vld [vmem:[#allocation7 + $0x90] sm:$0xff] }
  0x63   : > { %830 = vmatpush.bf16.msrb.mxu2 %v1372_v30 }
  0x65   : > { %699 = vmatpush.bf16.msrb.mxu0 %v1480_v3  ;;  %818 = vmatpush.bf16.msrb.mxu1 %v1360_v33  ;;  %v1499_v33 = vld [vmem:[#allocation7 + $0x88] sm:$0xff] }
  0x67   : > { %831 = vmatpush.bf16.msrb.mxu2 %v1364_v34  ;;  %v1508_v34 = vld [vmem:[#allocation7 + $0xd0] sm:$0xff] }
  0x69   : > { %700 = vmatpush.bf16.msrb.mxu0 %v1479_v4  ;;  %819 = vmatpush.bf16.msrb.mxu1 %v1352_v39  ;;  %v1319_v4 = vld [vmem:[#allocation5 + $0x90] sm:$0xf]  ;;  %v733_v39 = vperm.slane %v731_v38, 0 }
  0x6b   : > { %832 = vmatpush.bf16.msrb.mxu2 %v1356_v40 }
  0x6d   : > { %701 = vmatpush.bf16.msrb.mxu0 %v1478_v5  ;;  %820 = vmatpush.bf16.msrb.mxu1 %v1344_v45  ;;  %v1485_v5 = vld [vmem:[#allocation5 + $0x94] sm:$0xf0] }
  0x6e   : > { %v1320_v7 = vor.u32 %v1485_v5, %v1319_v4 }
  0x6f   : > { %833 = vmatpush.bf16.msrb.mxu2 %v1348_v46 }
  0x71   : > { %702 = vmatpush.bf16.msrb.mxu0 %v1477_v6  ;;  %821 = vmatpush.bf16.msrb.mxu1 %v1336_v51  ;;  %v1484_v6 = vld [vmem:[#allocation5 + $0x94] sm:$0xf]  ;;  %v1609_v51 = vld [vmem:[%s2069_s5 + $0x2] ss:$0 sm:$0xff] }
  0x73   : > { %834 = vmatpush.bf16.msrb.mxu2 %v1340_v52 }
  0x75   : > { %703 = vmatpush.bf16.msrb.mxu0 %v1476_v8  ;;  %822 = vmatpush.bf16.msrb.mxu1 %v1328_v57  ;;  %v1321_v8 = vld [vmem:[#allocation5 + $0x98] sm:$0xf0] }
  0x77   : > { %835 = vmatpush.bf16.msrb.mxu2 %v1332_v59 }
  0x79   : > { %704 = vmatpush.bf16.msrb.mxu0 %v1475_v21  ;;  %823 = vmatpush.bf16.msrb.mxu1 %v1320_v7  ;;  %v1511_v21 = vld [vmem:[#allocation7 + $0xe8] sm:$0xff] }
  0x7d   : > { %705 = vmatpush.bf16.msrb.mxu0 %v1474_v22  ;;  %v1502_v22 = vld [vmem:[#allocation7 + $0xa0] sm:$0xff] }
  0xdc   : > { %v448_v11 = vpop.f32.mrf.mxu0 }
  0xdd   : > { %v449_v12 = vadd.f32 %v448_v11, %v355_v9  ;;  %v461_v13 = vpop.f32.mrf.mxu1  ;;  %v1324_v9 = vor.u32 %v1484_v6, %v1321_v8  ;;  %v1483_v11 = vld [vmem:[#allocation5 + $0x84] sm:$0xf0] }
  0xde   : > { %v462_v14 = vadd.f32 %v461_v13, %v356_v10  ;;  %v1311_v10 = vld [vmem:[#allocation5 + $0x80] sm:$0xf] }
  0xdf   : > { %v465_v15 = vmax.f32 %v449_v12, 0.0  ;;  %836 = vmatpush.bf16.msrb.mxu2 %v1324_v9  ;;  %v1482_v12 = vld [vmem:[#allocation5 + $0x84] sm:$0xf]  ;;  %v1312_v13 = vor.u32 %v1483_v11, %v1311_v10 }
  0xe0   : > { %v466_v16 = vmax.f32 %v462_v14, 0.0  ;;  %v1313_v14 = vld [vmem:[#allocation5 + $0x88] sm:$0xf0] }
  0xe1   : > { %v467_v17 = vpack.c.bf16 %v465_v15, %v465_v15  ;;  %v1316_v15 = vor.u32 %v1482_v12, %v1313_v14  ;;  %824 = vmatpush.bf16.msrb.mxu1 %v1312_v13 }
  0xe2   : > { %v468_v18 = vpack.c.bf16 %v466_v16, %v466_v16  ;;  %v1505_v16 = vld [vmem:[#allocation7 + $0xb8] sm:$0xff] }
  0xe3   : > { %609 = vmatmul.bf16.vlgmr.msra.gmra.mxu2 %v467_v17  ;;  %v1513_v17 = vld [vmem:[#allocation7 + $0xf8] sm:$0xff]  ;;  %981 = vmatpush.bf16.msrb.mxu3 %v1505_v16 }
  0xe4   : > { %622 = vmatmul.bf16.vlgmr.msra.gmra.mxu3 %v468_v18  ;;  %v450_v19 = vpop.f32.mrf.mxu0  ;;  %837 = vmatpush.bf16.msrb.mxu2 %v1316_v15  ;;  %v1504_v18 = vld [vmem:[#allocation7 + $0xb0] sm:$0xff] }
  0xe5   : > { %v463_v20 = vpop.f32.mrf.mxu1  ;;  %994 = vmatpush.bf16.msra.mxu0 %v1513_v17  ;;  %v1512_v19 = vld [vmem:[#allocation7 + $0xf0] sm:$0xff] }
  0xe6   : > { %v1503_v20 = vld [vmem:[#allocation7 + $0xa8] sm:$0xff] }
  0xe7   : > { %982 = vmatpush.bf16.msrb.mxu3 %v1504_v18 }
  0xe9   : > { %995 = vmatpush.bf16.msra.mxu0 %v1512_v19 }
  0xeb   : > { %983 = vmatpush.bf16.msrb.mxu3 %v1503_v20 }
  0xed   : > { %996 = vmatpush.bf16.msra.mxu0 %v1511_v21 }
  0xef   : > { %984 = vmatpush.bf16.msrb.mxu3 %v1502_v22 }
  0xf1   : > { %997 = vmatpush.bf16.msra.mxu0 %v1510_v23 }
  0xf3   : > { %985 = vmatpush.bf16.msrb.mxu3 %v1501_v24 }
  0xf5   : > { %998 = vmatpush.bf16.msra.mxu0 %v1509_v25 }
  0xf7   : > { %986 = vmatpush.bf16.msrb.mxu3 %v1500_v26 }
  0xf9   : > { %999 = vmatpush.bf16.msra.mxu0 %v1508_v34 }
  0xfb   : > { %987 = vmatpush.bf16.msrb.mxu3 %v1499_v33 }
  0xfd   : > { %1000 = vmatpush.bf16.msra.mxu0 %v1507_v36 }
  0xff   : > { %988 = vmatpush.bf16.msrb.mxu3 %v1498_v35 }
 0x101   : > { %1001 = vmatpush.bf16.msra.mxu0 %v1506_v37 }
 0x166   : > { %v610_v60 = vpop.f32.mrf.mxu2 }
 0x167   : > { %v611_v61 = vadd.f32 %v1607_v58, %v610_v60  ;;  %v623_v62 = vpop.f32.mrf.mxu3 }
 0x169   : > { %v624_v63 = vadd.f32 %v623_v62, %v611_v61 }
 0x16b   : > { %v627_v0 = vmax.f32 %v624_v63, 0.0 }
 0x16d   : > { %v628_v1 = vpack.c.bf16 %v627_v0, %v627_v0 }
 0x16e   : > { %v612_v2 = vpop.f32.mrf.mxu2 }
 0x16f   : > { %v625_v3 = vpop.f32.mrf.mxu3  ;;  %706 = vmatmul.bf16.vlgmr.msrb.gmra.mxu0 %v628_v1 }
 0x1ec   : > { %v707_v28 = vpop.f32.mrf.mxu0 }
 0x1ed   : > { %v708_v29 = vadd.f32 %v1608_v27, %v707_v28 }
 0x1ef   : > { %v711_v30 = vmax.f32 %v708_v29, 0.0 }
 0x1f1   : > { %v712_v31 = vpack.c.bf16 %v711_v30, %v711_v30 }
 0x1f3   : > { %825 = vmatmul.bf16.vlgmr.msrb.gmra.mxu1 %v712_v31  ;;  %838 = vmatmul.bf16.vlgmr.msrb.gmra.mxu2 %v712_v31 }
 0x1f4   : > { %v709_v32 = vpop.f32.mrf.mxu0 }
 0x270   : > { %v826_v40 = vpop.f32.mrf.mxu1 }
 0x271   : > { %v827_v41 = vadd.f32 %v826_v40, %v733_v39 }
 0x273   : > { %v843_v42 = vmax.f32 %v827_v41, 0.0 }
 0x275   : > { %v845_v44 = vpack.c.bf16 %v843_v42, %v843_v42 }
 0x276   : > { %v839_v45 = vpop.f32.mrf.mxu2 }
 0x277   : > { %v840_v46 = vadd.f32 %v839_v45, %v734_v43  ;;  %989 = vmatmul.bf16.vlgmr.msrb.gmra.mxu3 %v845_v44 }
 0x278   : > { %v828_v47 = vpop.f32.mrf.mxu1 }
 0x279   : > { %v844_v48 = vmax.f32 %v840_v46, 0.0 }
 0x27b   : > { %v846_v49 = vpack.c.bf16 %v844_v48, %v844_v48 }
 0x27d   : > { %1002 = vmatmul.bf16.vlgmr.msra.gmra.mxu0 %v846_v49 }
 0x27e   : > { %v841_v50 = vpop.f32.mrf.mxu2 }
 0x2fa   : > { %v990_v52 = vpop.f32.mrf.mxu3  ;;  %v1003_v53 = vpop.f32.mrf.mxu0 }
 0x2fb   : > { %v991_v54 = vadd.f32 %v1609_v51, %v990_v52 }
 0x2fd   : > { %v1004_v55 = vadd.f32 %v1003_v53, %v991_v54 }
 0x2ff   : > { %1007 = vst [vmem:[%s334_s7] sm:$0xff] %v1004_v55 }
 0x300   : > { %1787 = shalt.err (!%p1784_p9)
}
 0x301   : > { %1532 = dma.vmem_to_hbm [thread:$0]  (%p1968_p4), %s1022_s18, 128, %s1024_s10, %s1009_s28  }
 0x302   : > { %v992_v56 = vpop.f32.mrf.mxu3  ;;  %v1005_v57 = vpop.f32.mrf.mxu0 }
 0x303 PF: > { %s1035_s19 = sand.u32 1, %s1822_s21   ;;  %p2080_p10 = scmp.ge.s32.totalorder %s1834_s24, 2 }
 0x304   : > { %s1036_s15 = scalar_lea.sflag [#allocation4], %s1035_s19 }
 0x305   : > { %p1552_p13 = pnand %p2080_p10, %p1972_p6 }
 0x307   : > { %p1553_p11 = pneg %p1552_p13 }
 0x309   : > { %1817 = dma.done.wait (%p1553_p11), %s1036_s15, 128  }
 0x30a   : > { %1819 = vsyncadd (%p1553_p11), %s1036_s15, 4294967168  ;;  %p21_p4 = scmp.ge.s32.totalorder %s1942_s14, 4   ;;  %s2081_s21 = smov %s1826_s22 }
 0x30b   : > { %s2082_s22 = smov %s1830_s23  ;;  %s2083_s23 = smov %s1953_s17 }
 0x30c   : > { %s2084_s24 = smov %s1942_s14  ;;  %23 = sbr.rel (!%p21_p4) target bundleno = 9 (0x9), region = 110 }
 0x311   :  { %1042 = vsyncpa [#allocation3], 1 }
 0x312   :  { %1044 = vsyncpa [#allocation3 + $0x1], 1 }
 0x313   :  { %1045 = vsyncpa [#allocation6], 1 }
 0x314   :  { %1046 = vsyncpa [#allocation9], 1 }
 0x315   :  { %1047 = vsyncpa [#allocation4], 1 }
 0x316   :  { %1049 = vsyncpa [#allocation4 + $0x1], 1 }

</bundles_post_ra>
